<compile_context>
chip_gen: v7x
topology: tpu7x:2x2x1
jax: 0.10.0
libtpu: 0.0.40
codegen_flags: <defaults>
</compile_context>

<pallas_src>
import functools

import numpy as np
import jax
import jax.numpy as jnp
from jax import lax
from jax.experimental import pallas as pl
from jax.experimental.pallas import tpu as pltpu

KSIZE = 7
PAD = KSIZE // 2          # 3
THRESH = 1e-4


def _shift_distances(span):
    """Shift-doubling distances whose cumulative coverage reaches `span`."""
    ds, s = [], 1
    while s < span:
        d = min(s, span - s)
        ds.append(d)
        s += d
    return ds


def _dilate_mask_kernel(mask_ref, x_ref, o_ref, *, hw, w_lane_step, w_steps, h_steps):
    # mask_ref: (n_masks, hw) f32 -- rows of {0, -inf} edge-validity masks
    # x_ref / o_ref: (TB, hw) native dtype -- TB images, flattened row-major h*W+w
    x = x_ref[...].astype(jnp.float32)

    def pool_axis(v, steps, lane_step):
        # Centered max over [-radius, +radius] (clipped; -inf edge padding, like
        # torch MaxPool2d) along one image axis, realized as lane rolls on the
        # flattened layout + shift-doubling.  Per roll: 1 XLU roll, 1 VALU add
        # (broadcast {0,-inf} edge mask) and 1 VALU max.
        fwd = v                            # fwd[l] = max x[l .. l + covered - 1]
        bwd = v                            # bwd[l] = max x[l - covered + 1 .. l]
        for d, f_row, b_row in steps:
            f_sh = pltpu.roll(fwd, shift=hw - d * lane_step, axis=1)   # fwd[l + d]
            fwd = jnp.maximum(fwd, f_sh + mask_ref[f_row:f_row + 1, :])
            b_sh = pltpu.roll(bwd, shift=d * lane_step, axis=1)        # bwd[l - d]
            bwd = jnp.maximum(bwd, b_sh + mask_ref[b_row:b_row + 1, :])
        return jnp.maximum(fwd, bwd)

    m = pool_axis(x, w_steps, 1)              # pool along W (within image rows)
    m = pool_axis(m, h_steps, w_lane_step)    # pool along H (across image rows)

    # binarize AFTER dilation (|max(x)| > t), write back in the native dtype
    o_ref[...] = jnp.where(jnp.abs(m) > THRESH,
                           jnp.float32(1.0), jnp.float32(0.0)).astype(o_ref.dtype)


def dilate_mask2(batch_mask, iter_num=8):
    """Pallas equivalent of DilateMask2(ksize=7).forward(batch_mask, iter_num)."""
    if iter_num is None:
        iter_num = 8
    N, C, H, W = batch_mask.shape
    dtype = batch_mask.dtype
    M, HW = N * C, H * W
    radius = PAD * int(iter_num)   # k iterations of a 7x7 pool == one pool of radius 3k

    # Free (contiguous) reshape; stays in the native dtype, cast happens in-kernel.
    x = batch_mask.reshape(M, HW)

    # ---- precomputed {0, -inf} edge masks: one (1, HW) row per (axis, dir, d) ----
    wpos = np.tile(np.arange(W, dtype=np.int64), H)
    hpos = np.repeat(np.arange(H, dtype=np.int64), W)
    neg = np.float32(-np.inf)
    rows, w_steps, h_steps = [], [], []
    for d in _shift_distances(min(radius + 1, W)):
        rows.append(np.where(wpos < W - d, np.float32(0.0), neg))   # forward (l+d)
        rows.append(np.where(wpos >= d, np.float32(0.0), neg))      # backward (l-d)
        w_steps.append((d, len(rows) - 2, len(rows) - 1))
    for d in _shift_distances(min(radius + 1, H)):
        rows.append(np.where(hpos < H - d, np.float32(0.0), neg))
        rows.append(np.where(hpos >= d, np.float32(0.0), neg))
        h_steps.append((d, len(rows) - 2, len(rows) - 1))
    if not rows:                                   # iter_num == 0 or 1x1 images
        rows.append(np.zeros(HW, np.float64))
    masks = jnp.asarray(np.stack(rows, axis=0).astype(np.float32))   # (n_masks, HW)
    n_masks = int(masks.shape[0])

    # ---- tile selection: tb divides M (no padded input copy), multiple of 8 ----
    # Block cap ~2 MiB of f32 working set per grid step (good DMA efficiency on
    # v5e, still comfortably double-buffered within a 32 MiB VMEM budget on v7x).
    # TODO(synk): very large planes (H*W*4 of several MiB) would need H-tiling
    # with a radius-sized halo instead of whole-image blocks.
    itemsize = jnp.dtype(dtype).itemsize
    BLOCK_CAP = 2 << 20
    cap_rows = max(8, BLOCK_CAP // (HW * 4))
    tb = None
    divisors = [d for d in range(8, min(M, cap_rows) + 1, 8) if M % d == 0]
    if divisors:
        # keep >= 2 grid blocks whenever M >= 16 (megacore / v7x 2 TensorCores)
        pref = [d for d in divisors if M // d >= 2] if M >= 16 else divisors
        tb = max(pref) if pref else max(divisors)
    pad = 0
    if tb is None:
        if M <= cap_rows:
            tb = M                                  # single block == full extent
        else:                                       # rare: M not a multiple of 8
            tb = max(8, (cap_rows // 8) * 8)
            pad = (-M) % tb
            x = jnp.pad(x, ((0, pad), (0, 0)))
    Mp = M + pad
    n_blocks = Mp // tb

    # VMEM budget: 2x double-buffered in/out blocks (native dtype) + in-kernel
    # f32 working set + the resident mask rows, capped at 32 MiB (v7x headroom).
    blk_io = tb * HW * itemsize
    blk_f32 = tb * HW * 4
    vmem_limit = int(min(32 * 2**20,
                         max(8 * 2**20,
                             4 * blk_io + 10 * blk_f32 + n_masks * HW * 4 + (1 << 20))))

    kernel = functools.partial(_dilate_mask_kernel, hw=HW, w_lane_step=W,
                               w_steps=tuple(w_steps), h_steps=tuple(h_steps))

    out = pl.pallas_call(
        kernel,
        out_shape=jax.ShapeDtypeStruct((Mp, HW), dtype),
        grid_spec=pltpu.PrefetchScalarGridSpec(
            num_scalar_prefetch=0,
            grid=(n_blocks,),
            in_specs=[
                pl.BlockSpec((n_masks, HW), lambda i: (0, 0)),   # resident edge masks
                pl.BlockSpec((tb, HW), lambda i: (i, 0)),        # tb images per step
            ],
            out_specs=pl.BlockSpec((tb, HW), lambda i: (i, 0)),
        ),
        compiler_params=pltpu.CompilerParams(
            dimension_semantics=("parallel",),
            vmem_limit_bytes=vmem_limit,
        ),
    )(masks, x)

    if pad:
        out = out[:M]
    return out.reshape(N, C, H, W)


def _reference(batch_mask, iter_num=8):
    """Pure-JAX reference matching torch MaxPool2d(7, stride=1, padding=3) loop."""
    m = batch_mask.astype(jnp.float32)
    for _ in range(iter_num):
        m = lax.reduce_window(
            m, -jnp.inf, lax.max,
            window_dimensions=(1, 1, KSIZE, KSIZE),
            window_strides=(1, 1, 1, 1),
            padding=((0, 0), (0, 0), (PAD, PAD), (PAD, PAD)),
        )
    return jnp.where(jnp.abs(m) > THRESH, 1.0, 0.0)


if __name__ == "__main__":
    key = jax.random.PRNGKey(0)
    N, C, H, W = 2, 4, 16, 16
    # sparse mask with both positive and negative nonzero values
    probe = jax.random.uniform(key, (N, C, H, W), dtype=jnp.float32)
    x = jnp.where(probe > 0.92, probe - 0.95, 0.0)

    # f32 path, several iteration counts
    for it in (1, 2, 8):
        y = jax.block_until_ready(dilate_mask2(x, iter_num=it))
        r = _reference(x, iter_num=it)
        assert y.shape == (N, C, H, W) and y.dtype == x.dtype
        assert jnp.array_equal(y, r), f"mismatch at iter_num={it} (f32)"

    # bf16 input exercises the in-kernel cast + native-dtype output path
    xb = x.astype(jnp.bfloat16)
    yb = jax.block_until_ready(dilate_mask2(xb, iter_num=8))
    rb = _reference(xb, iter_num=8)
    assert yb.dtype == jnp.bfloat16
    assert jnp.array_equal(yb.astype(jnp.float32), rb), "mismatch (bf16)"

    # second shape: M=16 -> 2 parallel grid blocks, lane width not a 128 multiple
    N2, C2, H2, W2 = 4, 4, 12, 20
    probe2 = jax.random.uniform(jax.random.PRNGKey(0), (N2, C2, H2, W2), dtype=jnp.float32)
    x2 = jnp.where(probe2 > 0.9, probe2 - 0.93, 0.0)
    y2 = jax.block_until_ready(dilate_mask2(x2, iter_num=8))
    r2 = _reference(x2, iter_num=8)
    assert jnp.array_equal(y2, r2), "mismatch (shape 2)"

    print("KERNEL_OK")
</pallas_src>

<mosaic_0001>
module attributes {stable_mosaic.version = 11 : i64} {
  func.func @_dilate_mask_kernel(%arg0: i32, %arg1: memref<8x256xf32, #tpu.memory_space<vmem>>, %arg2: memref<8x256xf32, #tpu.memory_space<vmem>>, %arg3: memref<8x256xf32, #tpu.memory_space<vmem>>) attributes {dimension_semantics = [#tpu.dimension_semantics<parallel>], iteration_bounds = array<i64: 1>, scalar_prefetch = 0 : i64, scratch_operands = 0 : i64, tpu.core_type = #tpu.core_type<tc>, window_params = [{pipeline_mode = #tpu.pipeline_mode<synchronous>, transform_indices = @transform_0, window_bounds = array<i64: 8, 256>}, {transform_indices = @transform_1, window_bounds = array<i64: 8, 256>}, {transform_indices = @transform_2, window_bounds = array<i64: 8, 256>}]} {
    %c0 = arith.constant 0 : index
    %c0_0 = arith.constant 0 : index
    %0 = vector.load %arg2[%c0, %c0_0] : memref<8x256xf32, #tpu.memory_space<vmem>>, vector<8x256xf32>
    %c255_i32 = arith.constant 255 : i32
    %1 = tpu.dynamic_rotate %0 by %c255_i32 dim 1 : vector<8x256xf32>, i32 -> vector<8x256xf32>
    %c0_1 = arith.constant 0 : index
    %c0_2 = arith.constant 0 : index
    %2 = vector.load %arg1[%c0_1, %c0_2] : memref<8x256xf32, #tpu.memory_space<vmem>>, vector<1x256xf32>
    %3 = vector.broadcast %2 : vector<1x256xf32> to vector<8x256xf32>
    %4 = arith.addf %1, %3 : vector<8x256xf32>
    %5 = arith.maximumf %0, %4 : vector<8x256xf32>
    %c1_i32 = arith.constant 1 : i32
    %6 = tpu.dynamic_rotate %0 by %c1_i32 dim 1 : vector<8x256xf32>, i32 -> vector<8x256xf32>
    %c1 = arith.constant 1 : index
    %c0_3 = arith.constant 0 : index
    %7 = vector.load %arg1[%c1, %c0_3] : memref<8x256xf32, #tpu.memory_space<vmem>>, vector<1x256xf32>
    %8 = vector.broadcast %7 : vector<1x256xf32> to vector<8x256xf32>
    %9 = arith.addf %6, %8 : vector<8x256xf32>
    %10 = arith.maximumf %0, %9 : vector<8x256xf32>
    %c254_i32 = arith.constant 254 : i32
    %11 = tpu.dynamic_rotate %5 by %c254_i32 dim 1 : vector<8x256xf32>, i32 -> vector<8x256xf32>
    %c2 = arith.constant 2 : index
    %c0_4 = arith.constant 0 : index
    %12 = vector.load %arg1[%c2, %c0_4] : memref<8x256xf32, #tpu.memory_space<vmem>>, vector<1x256xf32>
    %13 = vector.broadcast %12 : vector<1x256xf32> to vector<8x256xf32>
    %14 = arith.addf %11, %13 : vector<8x256xf32>
    %15 = arith.maximumf %5, %14 : vector<8x256xf32>
    %c2_i32 = arith.constant 2 : i32
    %16 = tpu.dynamic_rotate %10 by %c2_i32 dim 1 : vector<8x256xf32>, i32 -> vector<8x256xf32>
    %c3 = arith.constant 3 : index
    %c0_5 = arith.constant 0 : index
    %17 = vector.load %arg1[%c3, %c0_5] : memref<8x256xf32, #tpu.memory_space<vmem>>, vector<1x256xf32>
    %18 = vector.broadcast %17 : vector<1x256xf32> to vector<8x256xf32>
    %19 = arith.addf %16, %18 : vector<8x256xf32>
    %20 = arith.maximumf %10, %19 : vector<8x256xf32>
    %21 = arith.maximumf %15, %20 : vector<8x256xf32>
    %c240_i32 = arith.constant 240 : i32
    %22 = tpu.dynamic_rotate %21 by %c240_i32 dim 1 : vector<8x256xf32>, i32 -> vector<8x256xf32>
    %c4 = arith.constant 4 : index
    %c0_6 = arith.constant 0 : index
    %23 = vector.load %arg1[%c4, %c0_6] : memref<8x256xf32, #tpu.memory_space<vmem>>, vector<1x256xf32>
    %24 = vector.broadcast %23 : vector<1x256xf32> to vector<8x256xf32>
    %25 = arith.addf %22, %24 : vector<8x256xf32>
    %26 = arith.maximumf %21, %25 : vector<8x256xf32>
    %c16_i32 = arith.constant 16 : i32
    %27 = tpu.dynamic_rotate %21 by %c16_i32 dim 1 : vector<8x256xf32>, i32 -> vector<8x256xf32>
    %c5 = arith.constant 5 : index
    %c0_7 = arith.constant 0 : index
    %28 = vector.load %arg1[%c5, %c0_7] : memref<8x256xf32, #tpu.memory_space<vmem>>, vector<1x256xf32>
    %29 = vector.broadcast %28 : vector<1x256xf32> to vector<8x256xf32>
    %30 = arith.addf %27, %29 : vector<8x256xf32>
    %31 = arith.maximumf %21, %30 : vector<8x256xf32>
    %c224_i32 = arith.constant 224 : i32
    %32 = tpu.dynamic_rotate %26 by %c224_i32 dim 1 : vector<8x256xf32>, i32 -> vector<8x256xf32>
    %c6 = arith.constant 6 : index
    %c0_8 = arith.constant 0 : index
    %33 = vector.load %arg1[%c6, %c0_8] : memref<8x256xf32, #tpu.memory_space<vmem>>, vector<1x256xf32>
    %34 = vector.broadcast %33 : vector<1x256xf32> to vector<8x256xf32>
    %35 = arith.addf %32, %34 : vector<8x256xf32>
    %36 = arith.maximumf %26, %35 : vector<8x256xf32>
    %c32_i32 = arith.constant 32 : i32
    %37 = tpu.dynamic_rotate %31 by %c32_i32 dim 1 : vector<8x256xf32>, i32 -> vector<8x256xf32>
    %c7 = arith.constant 7 : index
    %c0_9 = arith.constant 0 : index
    %38 = vector.load %arg1[%c7, %c0_9] : memref<8x256xf32, #tpu.memory_space<vmem>>, vector<1x256xf32>
    %39 = vector.broadcast %38 : vector<1x256xf32> to vector<8x256xf32>
    %40 = arith.addf %37, %39 : vector<8x256xf32>
    %41 = arith.maximumf %31, %40 : vector<8x256xf32>
    %42 = arith.maximumf %36, %41 : vector<8x256xf32>
    %43 = math.absf %42 : vector<8x256xf32>
    %cst = arith.constant 9.99999974E-5 : f32
    %44 = vector.broadcast %cst : f32 to vector<8x256xf32>
    %45 = arith.cmpf ogt, %43, %44 : vector<8x256xf32>
    %cst_10 = arith.constant 1.000000e+00 : f32
    %cst_11 = arith.constant 0.000000e+00 : f32
    %46 = vector.broadcast %cst_10 : f32 to vector<8x256xf32>
    %47 = vector.broadcast %cst_11 : f32 to vector<8x256xf32>
    %48 = arith.select %45, %46, %47 : vector<8x256xi1>, vector<8x256xf32>
    %c0_12 = arith.constant 0 : index
    %c0_13 = arith.constant 0 : index
    %49 = vector.load %arg3[%c0_12, %c0_13] : memref<8x256xf32, #tpu.memory_space<vmem>>, vector<8x256xf32>
    tpu.vector_store %arg3[%c0_12, %c0_13], %48 {strides = array<i32>} : memref<8x256xf32, #tpu.memory_space<vmem>>, vector<8x256xf32>,
    return
  }
  func.func @transform_0(%arg0: i32) -> (i32, i32) {
    %c0_i32 = arith.constant 0 : i32
    %c0_i32_0 = arith.constant 0 : i32
    %c0_i32_1 = arith.constant 0 : i32
    return %c0_i32, %c0_i32_0 : i32, i32
  }
  func.func @transform_1(%arg0: i32) -> (i32, i32) {
    %c0_i32 = arith.constant 0 : i32
    %c0_i32_0 = arith.constant 0 : i32
    return %arg0, %c0_i32 : i32, i32
  }
  func.func @transform_2(%arg0: i32) -> (i32, i32) {
    %c0_i32 = arith.constant 0 : i32
    %c0_i32_0 = arith.constant 0 : i32
    return %arg0, %c0_i32 : i32, i32
  }
}

</mosaic_0001>

<bundles_post_ra>
// kernel: tpu_custom_call.1
= control target key start
LH: loop header
LB: loop body
LE: loop exit
PB: predicated region body
PF: predicated region fallthrough
CT: control target
= control target key end

     0   :  { %7 = vsyncpa [#allocation3], 0  ;;  %s436_s0 = inlined_call_operand.hbm [shape: f32[8,256], index: 0, kind: input, shape index: {}]   ;;  %s437_s1 = inlined_call_operand.hbm [shape: f32[8,256], index: 1, kind: input, shape index: {}]   ;;  %s438_s2 = inlined_call_operand.hbm [shape: f32[8,256], index: 2, kind: output, shape index: {}]  }
   0x1   :  { %8 = vsyncpa [#allocation6], 0 }
   0x2   :  { %9 = vsyncpa [#allocation4], 0  ;;  %s343_s9 = smov [#allocation2]   ;;  %s344_s11 = smov [#allocation5]  }
   0x3   :  { %s16_s10 = sshll.u32 %s343_s9, 4  ;;  %s26_s12 = sshll.u32 %s344_s11, 4  ;;  %s17_s10 = int_to_ptr.vmem [resolvable:$true] %s16_s10  ;;  %s27_s12 = int_to_ptr.vmem [resolvable:$true] %s26_s12 }
   0x4   :  { %s271_s15 = scalar_lea.hbm %s436_s0, 256 }
   0x5   :  { %p272_p0 = scmp.ne.s32.totalorder %s436_s0, %s271_s15  ;;  %p275_p1 = scmp.lt.u32.totalorder %s271_s15, %s436_s0 }
   0x7   :  { %p277_p2 = pnand %p275_p1, %p272_p0 }
   0x9   :  { %280 = shalt.err (!%p277_p2)
}
   0xa   :  { %s281_s20 = scalar_lea.vmem %s17_s10, 256  ;;  %p286_p4 = scmp.lt.s32.totalorder %s17_s10, %s17_s10 }
   0xb   :  { %p282_p3 = scmp.ne.s32.totalorder %s17_s10, %s281_s20  ;;  %p287_p5 = scmp.lt.s32.totalorder %s281_s20, %s281_s20 }
   0xd   :  { %p288_p6 = por %p287_p5, %p286_p4 }
   0xf   :  { %p289_p7 = pnand %p288_p6, %p282_p3 }
  0x11   :  { %292 = shalt.err (!%p289_p7)
}
  0x12   :  { %19 = dma.hbm_to_vmem [thread:$0]  %s436_s0, 256, %s17_s10, [#allocation3]  }
  0x13   :  { %s293_s25 = scalar_lea.hbm %s437_s1, 256 }
  0x14   :  { %p294_p8 = scmp.ne.s32.totalorder %s437_s1, %s293_s25  ;;  %p297_p9 = scmp.lt.u32.totalorder %s293_s25, %s437_s1 }
  0x16   :  { %p299_p10 = pnand %p297_p9, %p294_p8 }
  0x18   :  { %302 = shalt.err (!%p299_p10)
}
  0x19   :  { %s303_s30 = scalar_lea.vmem %s27_s12, 256  ;;  %p308_p12 = scmp.lt.s32.totalorder %s27_s12, %s27_s12 }
  0x1a   :  { %p304_p11 = scmp.ne.s32.totalorder %s27_s12, %s303_s30  ;;  %p309_p13 = scmp.lt.s32.totalorder %s303_s30, %s303_s30 }
  0x1c   :  { %p310_p0 = por %p309_p13, %p308_p12 }
  0x1e   :  { %p311_p1 = pnand %p310_p0, %p304_p11 }
  0x20   :  { %314 = shalt.err (!%p311_p1)
}
  0x21   :  { %29 = dma.hbm_to_vmem [thread:$0]  %s437_s1, 256, %s27_s12, [#allocation6]  }
  0x22   :  { %337 = dma.done.wait [#allocation3], 256  }
  0x23   :  { %338 = vsyncadd [#allocation3], 4294967040 }
  0x24   :  { %339 = dma.done.wait [#allocation6], 256  }
  0x25   :  { %340 = vsyncadd [#allocation6], 4294967040  ;;  %v36_v0 = vld [vmem:[#allocation5] sm:$0xff]  ;;  %s345_s4 = smov 1   ;;  %s346_s5 = smov 127   ;;  %v37_v1 = vld [vmem:[#allocation5 + $0x8] sm:$0xff]  ;;  %v42_v2 = vlaneseq }
  0x26   :  { %63 = vrot.lane.b32.xlu1 %v36_v0, %s345_s4  ;;  %38 = vrot.lane.b32.xlu0 %v36_v0, %s346_s5  ;;  %v47_v7 = vld [vmem:[#allocation2] ss:$8 sm:$0x3]  ;;  %v71_v10 = vld [vmem:[#allocation2 + $0x1] ss:$8 sm:$0x3] }
  0x27   :  { %v50_v3 = vshrl.u32 %v42_v2, 7  ;;  %v394_v4 = vand.u32 127, %v42_v2  ;;  %s347_s1 = smov 126   ;;  %s348_s6 = smov 2  }
  0x28   :  { %v95_v29 = vld [vmem:[#allocation2 + $0x2] ss:$8 sm:$0x3]  ;;  %v119_v30 = vld [vmem:[#allocation2 + $0x3] ss:$8 sm:$0x3] }
  0x29   :  { %v396_v5 = vsub.s32 0, %v50_v3  ;;  %v398_v6 = vsub.s32 1, %v50_v3  ;;  %vm67_vm0 = vcmp.lt.s32.totalorder %v394_v4, 1  ;;  %vm44_vm1 = vcmp.lt.s32.totalorder %v394_v4, 127  ;;  %s349_s7 = smov 112   ;;  %s350_s8 = smov 16  }
  0x2a   :  { %65 = vrot.lane.b32.xlu1 %v37_v1, %s345_s4  ;;  %40 = vrot.lane.b32.xlu0 %v37_v1, %s346_s5  ;;  %vm91_vm2 = vcmp.lt.s32.totalorder %v394_v4, 126  ;;  %vm115_vm3 = vcmp.lt.s32.totalorder %v394_v4, 2  ;;  %v145_v53 = vld [vmem:[#allocation2 + $0x4] ss:$8 sm:$0x3]  ;;  %vm141_vm4 = vcmp.lt.s32.totalorder %v394_v4, 112 }
  0x2b   :  { %v52_v11 = vrot.slane %v47_v7, %v396_v5  ;;  %v56_v12 = vrot.slane %v47_v7, %v398_v6  ;;  %v76_v13 = vrot.slane %v71_v10, %v396_v5  ;;  %v80_v14 = vrot.slane %v71_v10, %v398_v6  ;;  %v169_v56 = vld [vmem:[#allocation2 + $0x5] ss:$8 sm:$0x3]  ;;  %s351_s9 = smov 96   ;;  %s352_s10 = smov 32  }
  0x2c   :  { %v100_v32 = vrot.slane %v95_v29, %v396_v5  ;;  %v104_v33 = vrot.slane %v95_v29, %v398_v6  ;;  %v124_v37 = vrot.slane %v119_v30, %v396_v5  ;;  %v128_v38 = vrot.slane %v119_v30, %v398_v6  ;;  %s353_s11 = smov [#allocation7]  }
  0x2d   :  { %v150_v54 = vrot.slane %v145_v53, %v396_v5  ;;  %v154_v55 = vrot.slane %v145_v53, %v398_v6  ;;  %vm165_vm5 = vcmp.lt.s32.totalorder %v394_v4, 16  ;;  %v174_v63 = vrot.slane %v169_v56, %v396_v5  ;;  %s249_s12 = sshll.u32 %s353_s11, 4  ;;  %s250_s12 = int_to_ptr.vmem [resolvable:$true] %s249_s12 }
  0x2e   :  { %vm189_vm6 = vcmp.lt.s32.totalorder %v394_v4, 96  ;;  %vm213_vm7 = vcmp.lt.s32.totalorder %v394_v4, 32  ;;  %s315_s13 = scalar_lea.vmem %s250_s12, 256  ;;  %p320_p3 = scmp.lt.s32.totalorder %s250_s12, %s250_s12 }
  0x2f   :  { %p316_p2 = scmp.ne.s32.totalorder %s250_s12, %s315_s13  ;;  %p321_p4 = scmp.lt.s32.totalorder %s315_s13, %s315_s13 }
  0x31   :  { %p322_p5 = por %p321_p4, %p320_p3 }
  0x33   :  { %p323_p6 = pnand %p322_p5, %p316_p2 }
  0x98   :  { %v64_v8 = vpop.permute.xlu1 %63  ;;  %v39_v9 = vpop.permute.xlu0 %38 }
  0x9c   :  { %v66_v15 = vpop.permute.xlu1 %65  ;;  %v41_v16 = vpop.permute.xlu0 %40 }
  0x9d   :  { %v68_v17 = vsel %vm67_vm0, %v64_v8, %v66_v15  ;;  %v69_v18 = vsel %vm67_vm0, %v66_v15, %v64_v8  ;;  %v45_v19 = vsel %vm44_vm1, %v39_v9, %v41_v16  ;;  %v46_v20 = vsel %vm44_vm1, %v41_v16, %v39_v9  ;;  %v217_v15 = vld [vmem:[#allocation2 + $0x7] ss:$8 sm:$0x3] }
  0x9e   :  { %v59_v21 = vadd.f32 %v52_v11, %v45_v19  ;;  %v60_v22 = vadd.f32 %v56_v12, %v46_v20  ;;  %v83_v23 = vadd.f32 %v76_v13, %v69_v18  ;;  %v84_v24 = vadd.f32 %v80_v14, %v68_v17  ;;  %v193_v14 = vld [vmem:[#allocation2 + $0x6] ss:$8 sm:$0x3] }
  0x9f   :  { %v198_v17 = vrot.slane %v193_v14, %v396_v5  ;;  %v202_v18 = vrot.slane %v193_v14, %v398_v6 }
  0xa0   :  { %v62_v25 = vmax.f32 %v37_v1, %v60_v22  ;;  %v61_v26 = vmax.f32 %v36_v0, %v59_v21  ;;  %v86_v27 = vmax.f32 %v37_v1, %v84_v24  ;;  %v85_v28 = vmax.f32 %v36_v0, %v83_v23 }
  0xa1   :  { %v178_v0 = vrot.slane %v169_v56, %v398_v6  ;;  %v222_v22 = vrot.slane %v217_v15, %v396_v5  ;;  %v226_v23 = vrot.slane %v217_v15, %v398_v6  ;;  %v354_v6 = vmov 0.0  }
  0xa2   :  { %89 = vrot.lane.b32.xlu1 %v62_v25, %s347_s1  ;;  %87 = vrot.lane.b32.xlu0 %v61_v26, %s347_s1 }
  0xa6   :  { %113 = vrot.lane.b32.xlu1 %v86_v27, %s348_s6  ;;  %111 = vrot.lane.b32.xlu0 %v85_v28, %s348_s6 }
 0x114   :  { %v90_v31 = vpop.permute.xlu1 %89  ;;  %v88_v34 = vpop.permute.xlu0 %87 }
 0x115   :  { %v92_v35 = vsel %vm91_vm2, %v88_v34, %v90_v31  ;;  %v93_v36 = vsel %vm91_vm2, %v90_v31, %v88_v34 }
 0x116   :  { %v107_v39 = vadd.f32 %v100_v32, %v92_v35  ;;  %v108_v40 = vadd.f32 %v104_v33, %v93_v36 }
 0x118   :  { %v114_v41 = vpop.permute.xlu1 %113  ;;  %v112_v42 = vpop.permute.xlu0 %111  ;;  %v109_v47 = vmax.f32 %v61_v26, %v107_v39  ;;  %v110_v48 = vmax.f32 %v62_v25, %v108_v40 }
 0x119   :  { %v116_v43 = vsel %vm115_vm3, %v112_v42, %v114_v41  ;;  %v117_v44 = vsel %vm115_vm3, %v114_v41, %v112_v42 }
 0x11a   :  { %v131_v45 = vadd.f32 %v124_v37, %v117_v44  ;;  %v132_v46 = vadd.f32 %v128_v38, %v116_v43 }
 0x11c   :  { %v133_v49 = vmax.f32 %v85_v28, %v131_v45  ;;  %v134_v50 = vmax.f32 %v86_v27, %v132_v46 }
 0x11e   :  { %v135_v51 = vmax.f32 %v109_v47, %v133_v49  ;;  %v136_v52 = vmax.f32 %v110_v48, %v134_v50 }
 0x120   :  { %137 = vrot.lane.b32.xlu0 %v135_v51, %s349_s7  ;;  %139 = vrot.lane.b32.xlu1 %v136_v52, %s349_s7 }
 0x124   :  { %161 = vrot.lane.b32.xlu0 %v135_v51, %s350_s8  ;;  %163 = vrot.lane.b32.xlu1 %v136_v52, %s350_s8 }
 0x192   :  { %v138_v57 = vpop.permute.xlu0 %137  ;;  %v140_v58 = vpop.permute.xlu1 %139 }
 0x193   :  { %v142_v59 = vsel %vm141_vm4, %v138_v57, %v140_v58  ;;  %v143_v60 = vsel %vm141_vm4, %v140_v58, %v138_v57 }
 0x194   :  { %v157_v61 = vadd.f32 %v150_v54, %v142_v59  ;;  %v158_v62 = vadd.f32 %v154_v55, %v143_v60 }
 0x196   :  { %v162_v1 = vpop.permute.xlu0 %161  ;;  %v164_v2 = vpop.permute.xlu1 %163  ;;  %v160_v3 = vmax.f32 %v136_v52, %v158_v62  ;;  %v159_v7 = vmax.f32 %v135_v51, %v157_v61 }
 0x197   :  { %v166_v8 = vsel %vm165_vm5, %v162_v1, %v164_v2  ;;  %v167_v9 = vsel %vm165_vm5, %v164_v2, %v162_v1 }
 0x198   :  { %v181_v10 = vadd.f32 %v174_v63, %v167_v9  ;;  %v182_v11 = vadd.f32 %v178_v0, %v166_v8  ;;  %187 = vrot.lane.b32.xlu1 %v160_v3, %s351_s9  ;;  %185 = vrot.lane.b32.xlu0 %v159_v7, %s351_s9 }
 0x19a   :  { %v183_v12 = vmax.f32 %v135_v51, %v181_v10  ;;  %v184_v13 = vmax.f32 %v136_v52, %v182_v11 }
 0x19c   :  { %209 = vrot.lane.b32.xlu0 %v183_v12, %s352_s10  ;;  %211 = vrot.lane.b32.xlu1 %v184_v13, %s352_s10 }
 0x20a   :  { %v186_v16 = vpop.permute.xlu0 %185  ;;  %v188_v19 = vpop.permute.xlu1 %187 }
 0x20b   :  { %v190_v20 = vsel %vm189_vm6, %v186_v16, %v188_v19  ;;  %v191_v21 = vsel %vm189_vm6, %v188_v19, %v186_v16 }
 0x20c   :  { %v205_v24 = vadd.f32 %v198_v17, %v190_v20  ;;  %v206_v25 = vadd.f32 %v202_v18, %v191_v21 }
 0x20e   :  { %v210_v26 = vpop.permute.xlu0 %209  ;;  %v212_v27 = vpop.permute.xlu1 %211  ;;  %v207_v32 = vmax.f32 %v159_v7, %v205_v24  ;;  %v208_v33 = vmax.f32 %v160_v3, %v206_v25 }
 0x20f   :  { %v214_v28 = vsel %vm213_vm7, %v210_v26, %v212_v27  ;;  %v215_v29 = vsel %vm213_vm7, %v212_v27, %v210_v26 }
 0x210   :  { %v229_v30 = vadd.f32 %v222_v22, %v215_v29  ;;  %v230_v31 = vadd.f32 %v226_v23, %v214_v28 }
 0x212   :  { %v231_v34 = vmax.f32 %v183_v12, %v229_v30  ;;  %v232_v35 = vmax.f32 %v184_v13, %v230_v31 }
 0x214   :  { %v233_v36 = vmax.f32 %v207_v32, %v231_v34  ;;  %v234_v37 = vmax.f32 %v208_v33, %v232_v35 }
 0x216   :  { %v235_v4 = vand.u32 2147483647, %v233_v36  ;;  %v236_v5 = vand.u32 2147483647, %v234_v37 }
 0x218   :  { %vm237_vm8 = vcmp.gt.f32.partialorder %v235_v4, 0.0001  ;;  %vm238_vm9 = vcmp.gt.f32.partialorder %v236_v5, 0.0001 }
 0x219   :  { %v239_v38 = vsel %vm237_vm8, 1.0, %v354_v6  ;;  %v240_v39 = vsel %vm238_vm9, 1.0, %v354_v6 }
 0x21a   :  { %241 = vst [vmem:[#allocation7] sm:$0xff] %v239_v38  ;;  %242 = vst [vmem:[#allocation7 + $0x8] sm:$0xff] %v240_v39 }
 0x21b   :  { %326 = shalt.err (!%p323_p6)
}
 0x21c   :  { %s327_s16 = scalar_lea.hbm %s438_s2, 256 }
 0x21d   :  { %p328_p7 = scmp.ne.s32.totalorder %s438_s2, %s327_s16  ;;  %p331_p8 = scmp.lt.u32.totalorder %s327_s16, %s438_s2 }
 0x21f   :  { %p333_p9 = pnand %p331_p8, %p328_p7 }
 0x221   :  { %336 = shalt.err (!%p333_p9)
}
 0x222   :  { %252 = dma.vmem_to_hbm [thread:$0]  %s250_s12, 256, %s438_s2, [#allocation4]  }
 0x223   :  { %341 = dma.done.wait [#allocation4], 256  }
 0x224   :  { %342 = vsyncadd [#allocation4], 4294967040 }
 0x225   :  { %256 = vsyncpa [#allocation3], 1 }
 0x226   :  { %257 = vsyncpa [#allocation6], 1 }
 0x227   :  { %258 = vsyncpa [#allocation4], 1 }

</bundles_post_ra>
